<compile_context>
chip_gen: v7x
topology: tpu7x:2x2x1
jax: 0.10.0
libtpu: 0.0.40
codegen_flags: <defaults>
</compile_context>

<pallas_src>
import functools
import math

import jax
import jax.numpy as jnp
from jax.experimental import pallas as pl
from jax.experimental.pallas import tpu as pltpu


def _round_up(x, m):
    return ((x + m - 1) // m) * m


def _mlp_kernel(n_layers, compute_dtype, x_ref, *refs):
    """Fused MLP: all layers in one kernel invocation.

    refs = (w_0, b_0, w_1, b_1, ..., w_{L-1}, b_{L-1}, out_ref)
    Matmul operands are `compute_dtype` (bf16) -> MXU with f32 accumulation;
    bias add / ReLU run on the f32 VPU path.  Dropout is identity (eval mode).
    """
    out_ref = refs[-1]
    params = refs[:-1]

    h = x_ref[...]                                     # (bb, ninp), compute_dtype
    for li in range(n_layers):
        w = params[2 * li][...]                        # (in_i, out_i), compute_dtype
        b = params[2 * li + 1][...]                    # (1, out_i),   float32
        acc = jnp.dot(h, w, preferred_element_type=jnp.float32) + b
        if li < n_layers - 1:
            acc = jnp.maximum(acc, 0.0)                # ReLU in f32 (safe on v5e VPU)
            h = acc.astype(compute_dtype)              # back to bf16 for the next MXU matmul
        else:
            out_ref[...] = acc.astype(out_ref.dtype)


def mlp_pallas(x, weights, biases, *, block_b=256, param_dtype=jnp.bfloat16):
    """Run the MLP forward pass as a single Pallas TPU kernel.

    x:        (B, ninp) float32
    weights:  list of (in_i, out_i) float32 arrays
    biases:   list of (1, out_i) float32 arrays
    Returns:  (B, nout) float32
    """
    assert len(weights) == len(biases)
    n_layers = len(weights)
    B, ninp = x.shape
    nout = weights[-1].shape[1]

    # ---- lane-dense output: pad nout up to a multiple of 128, slice afterwards ----
    nout_pad = _round_up(max(nout, 1), 128)

    # ---- batch tile: large (MXU-filling) but >= 2 grid steps when B allows it ----
    bb = min(block_b, _round_up(max((B + 1) // 2, 16), 16))
    bb = max(16, _round_up(bb, 16))          # 16-row granule (bf16 sublane packing)
    B_pad = _round_up(B, bb)
    grid = (B_pad // bb,)

    # ---- operands: bf16 storage for matmul operands, f32 biases ----
    x_p = jnp.pad(x.astype(param_dtype), ((0, B_pad - B), (0, 0)))
    ws, bs = [], []
    for li, (w, b) in enumerate(zip(weights, biases)):
        if li == n_layers - 1:
            w = jnp.pad(w, ((0, 0), (0, nout_pad - nout)))
            b = jnp.pad(b, ((0, 0), (0, nout_pad - nout)))
        ws.append(w.astype(param_dtype))
        bs.append(b.astype(jnp.float32))

    in_specs = [pl.BlockSpec((bb, ninp), lambda i: (i, 0))]
    operands = [x_p]
    for w, b in zip(ws, bs):
        # Full-shape blocks (grid-invariant, resident in VMEM for every step).
        in_specs.append(pl.BlockSpec(w.shape, lambda i: (0, 0)))
        in_specs.append(pl.BlockSpec(b.shape, lambda i: (0, 0)))
        operands.append(w)
        operands.append(b)
    out_spec = pl.BlockSpec((bb, nout_pad), lambda i: (i, 0))

    # ---- cost estimate (helps XLA schedule the custom call) ----
    flops = 2 * B_pad * sum(int(w.shape[0]) * int(w.shape[1]) for w in ws)
    bytes_accessed = sum(int(a.size) * a.dtype.itemsize for a in operands)
    bytes_accessed += B_pad * nout_pad * 4
    cost = pl.CostEstimate(flops=flops, transcendentals=0,
                           bytes_accessed=int(bytes_accessed))

    # ---- explicit VMEM budget (double-buffered I/O tiles + resident params) ----
    itm = jnp.dtype(param_dtype).itemsize
    param_vmem = sum(int(w.size) * itm + int(b.size) * 4 for w, b in zip(ws, bs))
    widest = max([ninp] + [int(w.shape[1]) for w in ws])
    tile_vmem = 2 * (bb * ninp * itm + bb * nout_pad * 4)
    act_vmem = 4 * bb * widest * 4
    est = 2 * param_vmem + tile_vmem + act_vmem
    vmem_limit = int(min(max(2 * est, 32 * 1024 * 1024), 64 * 1024 * 1024))

    out = pl.pallas_call(
        functools.partial(_mlp_kernel, n_layers, param_dtype),
        out_shape=jax.ShapeDtypeStruct((B_pad, nout_pad), jnp.float32),
        grid_spec=pltpu.PrefetchScalarGridSpec(
            num_scalar_prefetch=0,
            grid=grid,
            in_specs=in_specs,
            out_specs=out_spec,
        ),
        compiler_params=pltpu.CompilerParams(
            dimension_semantics=("parallel",),
            vmem_limit_bytes=vmem_limit,
        ),
        cost_estimate=cost,
    )(*operands)

    return out[:B, :nout]


def init_mlp_params(key, ninp, nhid, nout, nlayers):
    """Deterministic PyTorch-style (uniform +/- 1/sqrt(fan_in)) init.

    Weights are returned already transposed to (in, out)."""
    if nlayers == 1:
        dims = [(ninp, nout)]
    else:
        dims = [(ninp, nhid)]
        dims += [(nhid, nhid)] * (nlayers - 2)
        dims += [(nhid, nout)]

    weights, biases = [], []
    for (fan_in, fan_out) in dims:
        key, kw, kb = jax.random.split(key, 3)
        bound = 1.0 / math.sqrt(fan_in)
        w = jax.random.uniform(kw, (fan_in, fan_out), jnp.float32, -bound, bound)
        b = jax.random.uniform(kb, (1, fan_out), jnp.float32, -bound, bound)
        weights.append(w)
        biases.append(b)
    return weights, biases


def mlp_reference(x, weights, biases, compute_dtype=jnp.bfloat16):
    """Pure-JAX reference mirroring the kernel's bf16-storage / f32-accumulate numerics."""
    h = x.astype(compute_dtype)
    for li, (w, b) in enumerate(zip(weights, biases)):
        acc = jnp.dot(h, w.astype(compute_dtype),
                      preferred_element_type=jnp.float32) + b.astype(jnp.float32)
        if li < len(weights) - 1:
            acc = jnp.maximum(acc, 0.0)
            h = acc.astype(compute_dtype)
        else:
            return acc
    return h.astype(jnp.float32)


if __name__ == "__main__":
    # Module config: MLP(ninp=32, nhid=64, nout=16, nlayers=3, dropout=0.1), eval mode.
    ninp, nhid, nout, nlayers = 32, 64, 16, 3
    B = 48  # not a multiple of the tile -> exercises padded-tail handling + 2-step grid

    key = jax.random.PRNGKey(0)
    key, kx = jax.random.split(key)
    x = jax.random.normal(kx, (B, ninp), jnp.float32)

    weights, biases = init_mlp_params(key, ninp, nhid, nout, nlayers)

    out = mlp_pallas(x, weights, biases)
    out = jax.block_until_ready(out)

    ref = mlp_reference(x, weights, biases)
    assert out.shape == (B, nout)
    assert jnp.allclose(out, ref, atol=2e-2, rtol=2e-2), "mismatch vs reference"

    print("KERNEL_OK")
</pallas_src>

<mosaic_0001>
module attributes {stable_mosaic.version = 11 : i64} {
  func.func @_mlp_kernel(%arg0: i32, %arg1: memref<32x32xbf16, #tpu.memory_space<vmem>>, %arg2: memref<32x64xbf16, #tpu.memory_space<vmem>>, %arg3: memref<1x64xf32, #tpu.memory_space<vmem>>, %arg4: memref<64x64xbf16, #tpu.memory_space<vmem>>, %arg5: memref<1x64xf32, #tpu.memory_space<vmem>>, %arg6: memref<64x128xbf16, #tpu.memory_space<vmem>>, %arg7: memref<1x128xf32, #tpu.memory_space<vmem>>, %arg8: memref<32x128xf32, #tpu.memory_space<vmem>>) attributes {dimension_semantics = [#tpu.dimension_semantics<parallel>], iteration_bounds = array<i64: 2>, scalar_prefetch = 0 : i64, scratch_operands = 0 : i64, tpu.core_type = #tpu.core_type<tc>, window_params = [{transform_indices = @transform_0, window_bounds = array<i64: 32, 32>}, {pipeline_mode = #tpu.pipeline_mode<synchronous>, transform_indices = @transform_1, window_bounds = array<i64: 32, 64>}, {pipeline_mode = #tpu.pipeline_mode<synchronous>, transform_indices = @transform_2, window_bounds = array<i64: 1, 64>}, {pipeline_mode = #tpu.pipeline_mode<synchronous>, transform_indices = @transform_3, window_bounds = array<i64: 64, 64>}, {pipeline_mode = #tpu.pipeline_mode<synchronous>, transform_indices = @transform_4, window_bounds = array<i64: 1, 64>}, {pipeline_mode = #tpu.pipeline_mode<synchronous>, transform_indices = @transform_5, window_bounds = array<i64: 64, 128>}, {pipeline_mode = #tpu.pipeline_mode<synchronous>, transform_indices = @transform_6, window_bounds = array<i64: 1, 128>}, {transform_indices = @transform_7, window_bounds = array<i64: 32, 128>}]} {
    %c0 = arith.constant 0 : index
    %c0_0 = arith.constant 0 : index
    %0 = vector.load %arg1[%c0, %c0_0] : memref<32x32xbf16, #tpu.memory_space<vmem>>, vector<32x32xbf16>
    %c0_1 = arith.constant 0 : index
    %c0_2 = arith.constant 0 : index
    %1 = vector.load %arg2[%c0_1, %c0_2] : memref<32x64xbf16, #tpu.memory_space<vmem>>, vector<32x64xbf16>
    %c0_3 = arith.constant 0 : index
    %c0_4 = arith.constant 0 : index
    %2 = vector.load %arg3[%c0_3, %c0_4] : memref<1x64xf32, #tpu.memory_space<vmem>>, vector<1x64xf32>
    %cst = arith.constant dense<0.000000e+00> : vector<32x64xf32>
    %3 = tpu.matmul %0, %1, %cst {dimension_numbers = #tpu.dot_dimension_numbers<[1], [0], [0], [1], [0, 0, 1, 1], [], []>} : vector<32x32xbf16>, vector<32x64xbf16>, vector<32x64xf32> -> vector<32x64xf32>
    %4 = vector.broadcast %2 : vector<1x64xf32> to vector<32x64xf32>
    %5 = arith.addf %3, %4 : vector<32x64xf32>
    %cst_5 = arith.constant 0.000000e+00 : f32
    %6 = vector.broadcast %cst_5 : f32 to vector<32x64xf32>
    %7 = arith.maximumf %5, %6 : vector<32x64xf32>
    %8 = arith.truncf %7 : vector<32x64xf32> to vector<32x64xbf16>
    %c0_6 = arith.constant 0 : index
    %c0_7 = arith.constant 0 : index
    %9 = vector.load %arg4[%c0_6, %c0_7] : memref<64x64xbf16, #tpu.memory_space<vmem>>, vector<64x64xbf16>
    %c0_8 = arith.constant 0 : index
    %c0_9 = arith.constant 0 : index
    %10 = vector.load %arg5[%c0_8, %c0_9] : memref<1x64xf32, #tpu.memory_space<vmem>>, vector<1x64xf32>
    %cst_10 = arith.constant dense<0.000000e+00> : vector<32x64xf32>
    %11 = tpu.matmul %8, %9, %cst_10 {dimension_numbers = #tpu.dot_dimension_numbers<[1], [0], [0], [1], [0, 0, 1, 1], [], []>} : vector<32x64xbf16>, vector<64x64xbf16>, vector<32x64xf32> -> vector<32x64xf32>
    %12 = vector.broadcast %10 : vector<1x64xf32> to vector<32x64xf32>
    %13 = arith.addf %11, %12 : vector<32x64xf32>
    %cst_11 = arith.constant 0.000000e+00 : f32
    %14 = vector.broadcast %cst_11 : f32 to vector<32x64xf32>
    %15 = arith.maximumf %13, %14 : vector<32x64xf32>
    %16 = arith.truncf %15 : vector<32x64xf32> to vector<32x64xbf16>
    %c0_12 = arith.constant 0 : index
    %c0_13 = arith.constant 0 : index
    %17 = vector.load %arg6[%c0_12, %c0_13] : memref<64x128xbf16, #tpu.memory_space<vmem>>, vector<64x128xbf16>
    %c0_14 = arith.constant 0 : index
    %c0_15 = arith.constant 0 : index
    %18 = vector.load %arg7[%c0_14, %c0_15] : memref<1x128xf32, #tpu.memory_space<vmem>>, vector<1x128xf32>
    %cst_16 = arith.constant dense<0.000000e+00> : vector<32x128xf32>
    %19 = tpu.matmul %16, %17, %cst_16 {dimension_numbers = #tpu.dot_dimension_numbers<[1], [0], [0], [1], [0, 0, 1, 1], [], []>} : vector<32x64xbf16>, vector<64x128xbf16>, vector<32x128xf32> -> vector<32x128xf32>
    %20 = vector.broadcast %18 : vector<1x128xf32> to vector<32x128xf32>
    %21 = arith.addf %19, %20 : vector<32x128xf32>
    %c0_17 = arith.constant 0 : index
    %c0_18 = arith.constant 0 : index
    %22 = vector.load %arg8[%c0_17, %c0_18] : memref<32x128xf32, #tpu.memory_space<vmem>>, vector<32x128xf32>
    tpu.vector_store %arg8[%c0_17, %c0_18], %21 {strides = array<i32>} : memref<32x128xf32, #tpu.memory_space<vmem>>, vector<32x128xf32>,
    return
  }
  func.func @transform_0(%arg0: i32) -> (i32, i32) {
    %c0_i32 = arith.constant 0 : i32
    %c0_i32_0 = arith.constant 0 : i32
    return %arg0, %c0_i32 : i32, i32
  }
  func.func @transform_1(%arg0: i32) -> (i32, i32) {
    %c0_i32 = arith.constant 0 : i32
    %c0_i32_0 = arith.constant 0 : i32
    %c0_i32_1 = arith.constant 0 : i32
    return %c0_i32, %c0_i32_0 : i32, i32
  }
  func.func @transform_2(%arg0: i32) -> (i32, i32) {
    %c0_i32 = arith.constant 0 : i32
    %c0_i32_0 = arith.constant 0 : i32
    %c0_i32_1 = arith.constant 0 : i32
    return %c0_i32, %c0_i32_0 : i32, i32
  }
  func.func @transform_3(%arg0: i32) -> (i32, i32) {
    %c0_i32 = arith.constant 0 : i32
    %c0_i32_0 = arith.constant 0 : i32
    %c0_i32_1 = arith.constant 0 : i32
    return %c0_i32, %c0_i32_0 : i32, i32
  }
  func.func @transform_4(%arg0: i32) -> (i32, i32) {
    %c0_i32 = arith.constant 0 : i32
    %c0_i32_0 = arith.constant 0 : i32
    %c0_i32_1 = arith.constant 0 : i32
    return %c0_i32, %c0_i32_0 : i32, i32
  }
  func.func @transform_5(%arg0: i32) -> (i32, i32) {
    %c0_i32 = arith.constant 0 : i32
    %c0_i32_0 = arith.constant 0 : i32
    %c0_i32_1 = arith.constant 0 : i32
    return %c0_i32, %c0_i32_0 : i32, i32
  }
  func.func @transform_6(%arg0: i32) -> (i32, i32) {
    %c0_i32 = arith.constant 0 : i32
    %c0_i32_0 = arith.constant 0 : i32
    %c0_i32_1 = arith.constant 0 : i32
    return %c0_i32, %c0_i32_0 : i32, i32
  }
  func.func @transform_7(%arg0: i32) -> (i32, i32) {
    %c0_i32 = arith.constant 0 : i32
    %c0_i32_0 = arith.constant 0 : i32
    return %arg0, %c0_i32 : i32, i32
  }
}

</mosaic_0001>

<bundles_post_ra>
// kernel: tpu_custom_call.1
= control target key start
LH: loop header
LB: loop body
LE: loop exit
PB: predicated region body
PF: predicated region fallthrough
CT: control target
= control target key end

     0   :  { %12 = vsyncpa [#allocation3], 0  ;;  %s1148_s0 = inlined_call_operand.vmem [shape: bf16[64,32], index: 0, kind: input, shape index: {}]   ;;  %s1149_s1 = inlined_call_operand.hbm [shape: bf16[32,64], index: 1, kind: input, shape index: {}]   ;;  %s1150_s2 = inlined_call_operand.vmem [shape: f32[1,64], index: 2, kind: input, shape index: {}]   ;;  %s1151_s3 = inlined_call_operand.vmem [shape: bf16[64,64], index: 3, kind: input, shape index: {}]   ;;  %s1152_s4 = inlined_call_operand.vmem [shape: f32[1,64], index: 4, kind: input, shape index: {}]   ;;  %s1153_s5 = inlined_call_operand.vmem [shape: bf16[64,128], index: 5, kind: input, shape index: {}]   ;;  %s1154_s6 = inlined_call_operand.vmem [shape: f32[1,128], index: 6, kind: input, shape index: {}]   ;;  %s1155_s7 = inlined_call_operand.hbm [shape: f32[64,128], index: 7, kind: output, shape index: {}]  }
   0x1   :  { %13 = vsyncpa [#allocation4], 0 }
   0x2   :  { %15 = vsyncpa [#allocation4 + $0x1], 0  ;;  %s974_s24 = smov 0   ;;  %s976_s25 = smov 0  }
   0x3   :  { %s978_s26 = smov 0   ;;  %s980_s27 = smov 0  }
   0x4 LB: > { %s995_s28 = sadd.s32 4294967295, %s926_s27   ;;  %s682_s29 = sadd.s32 4294967294, %s926_s27   ;;  %s926_s27 = sphi %s980_s27, %s1171_s27   ;;  %s922_s26 = sphi %s978_s26, %s1170_s26   ;;  %s918_s25 = sphi %s976_s25, %s1169_s25   ;;  %s914_s24 = sphi %s974_s24, %s1168_s24  }
   0x5   : > { %s999_s30 = sadd.s32 1, %s926_s27   ;;  %s180_s8 = sadd.s32 1, %s922_s26 }
   0x6   : > { %s177_s9 = ssub.s32 %s926_s27, %s999_s30  ;;  %p190_p0 = scmp.ne.s32.totalorder %s922_s26, %s918_s25 }
   0x7   : > { %p178_p1 = scmp.eq.s32.totalorder %s177_s9, 0  ;;  %p191_p2 = scmp.eq.s32.totalorder %s995_s28, 1 }
   0x8   : > { %p196_p3 = scmp.ne.s32.totalorder %s918_s25, %s914_s24  ;;  %p197_p4 = scmp.eq.s32.totalorder %s682_s29, 1 }
   0x9   : > { %s1010_s10 = scalar_select %p178_p1, %s922_s26, %s180_s8  }
   0xa   : > { %p1012_p5 = por %p191_p2, %p190_p0  ;;  %p1016_p6 = por %p197_p4, %p196_p3 }
   0xb   : > { %p683_p7 = scmp.ge.s32.totalorder %s926_s27, 1  ;;  %p204_p8 = scmp.lt.s32.totalorder %s926_s27, 3 }
   0xc   : > { %s1159_s11 = scalar_select %p1012_p5, 1, 0 }
   0xd   : > { %s1160_s12 = scalar_select %p1016_p6, 1, 0 }
   0xe   : > { %p1156_p9 = scmp.eq.s32.totalorder %s995_s28, 0  ;;  %p1023_p10 = pnand %p683_p7, %p204_p8 }
   0xf   : > { %s928_s14 = smov [#allocation2]   ;;  %s832_s19 = scalar_lea.hbm %s1149_s1, 256 }
  0x10   : > { %s1161_s13 = scalar_select %p1023_p10, 1, 0 }
  0x11   : > { %s216_s15 = sshll.u32 %s928_s14, 4  ;;  %p772_p11 = pneg %p1023_p10  ;;  %s217_s15 = int_to_ptr.vmem [resolvable:$true] %s216_s15 }
  0x12   : > { %p833_p13 = scmp.ne.s32.totalorder %s1149_s1, %s832_s19  ;;  %p839_p3 = scmp.lt.u32.totalorder %s832_s19, %s1149_s1 }
  0x13   : > { %p1031_p12 = pnand %p1156_p9, %p772_p11 }
  0x15   : > { %p834_p0 = pneg %p1031_p12 }
  0x17   : > { %p835_p1 = pnand %p834_p0, %p833_p13 }
  0x19   : > { %p836_p2 = pneg %p835_p1 }
  0x1b   : > { %p841_p4 = pnand %p839_p3, %p836_p2 }
  0x1d   : > { %844 = shalt.err (!%p841_p4)
}
  0x1e   : > { %s845_s29 = scalar_lea.vmem %s217_s15, 256  ;;  %p853_p9 = scmp.lt.s32.totalorder %s217_s15, %s217_s15 }
  0x1f   : > { %p846_p7 = scmp.ne.s32.totalorder %s217_s15, %s845_s29  ;;  %p854_p6 = scmp.lt.s32.totalorder %s845_s29, %s845_s29 }
  0x21   : > { %p848_p8 = pnand %p846_p7, %p834_p0  ;;  %p855_p5 = por %p854_p6, %p853_p9 }
  0x23   : > { %p849_p11 = pneg %p848_p8 }
  0x25   : > { %p856_p10 = pnand %p855_p5, %p849_p11 }
  0x27   : > { %859 = shalt.err (!%p856_p10)
}
  0x28   : > { %s929_s8 = smov 64   ;;  %s930_s9 = smov 4  }
  0x29   : > { %775 = dma.hbm_to_vmem [thread:$0]  (!%p1031_p12), %s1149_s1, 256, %s217_s15, [#allocation3], %s929_s8, %s929_s8, %s930_s9  }
  0x2a   : > { %p1163_p13 = scmp.ne.s32.totalorder %s1161_s13, 0 }
  0x2b   : > { %p1164_p1 = scmp.eq.s32.totalorder (!%p1163_p13), %s995_s28, 0 }
  0x2c   : > { %256 = sbr.rel (%p1163_p13) target bundleno = 737 (0x2e1), region = 48 }
  0x33   : > { %905 = dma.done.wait (%p1164_p1), [#allocation3], 256   ;;  %p1165_p0 = pmov %p1164_p1 }
  0x34   : > { %s689_s18 = sshll.u32 %s995_s28, 2  ;;  %v820_v0 = vld [vmem:[#allocation2] sm:$0xff]   ;;  %v821_v1 = vld [vmem:[#allocation2 + $0x8] sm:$0xff]   ;;  %vm333_vm0 = vcmask 261120   ;;  %v826_v6 = vld [vmem:[%s1151_s3 + $0x10] sm:$0xff]   ;;  %vm434_vm1 = vcmask 523264  }
  0x35   : > { %907 = vsyncadd (%p1165_p0), [#allocation3], 4294967040  ;;  %p289_p5 = scmp.lt.s32.totalorder %s689_s18, 7  ;;  %734 = vmatprep.subr.bf16.mxu0 %v820_v0  ;;  %v824_v4 = vld [vmem:[%s1151_s3] sm:$0xff]   ;;  %v825_v5 = vld [vmem:[%s1151_s3 + $0x8] sm:$0xff]   ;;  %s285_s9 = sand.u32 1, %s918_s25  }
  0x36   : > { %735 = vmatpush3.bf16.msra.mxu0 %v820_v0  ;;  %742 = vmatprep.subr.bf16.mxu1 %v824_v4  ;;  %v827_v7 = vld [vmem:[%s1151_s3 + $0x18] sm:$0xff]   ;;  %v828_v8 = vld [vmem:[%s1153_s5] sm:$0xff]   ;;  %v829_v9 = vld [vmem:[%s1153_s5 + $0x8] sm:$0xff]   ;;  %s688_s14 = sshll.u32 %s285_s9, 5  ;;  %s717_s16 = sshll.u32 %s995_s28, 9 }
  0x37   : > { %s1173_s18 = smov (!%p289_p5, %s689_s18), 7  ;;  %736 = vmatprep.subr.bf16.mxu0 %v821_v1  ;;  %743 = vmatpush3.bf16.msra.mxu1 %v824_v4  ;;  %v691_v10 = vld [vmem:[%s1150_s2] ss:$0 sm:$0xff]  ;;  %v830_v25 = vld [vmem:[%s1153_s5 + $0x10] sm:$0xff]   ;;  %v831_v26 = vld [vmem:[%s1153_s5 + $0x18] sm:$0xff]   ;;  %s1105_s15 = scalar_lea.hbm %s1155_s7, %s717_s16 }
  0x38   : > { %s690_s19 = sshll.u32 %s1173_s18, 2  ;;  %744 = vmatprep.subr.bf16.mxu1 %v825_v5  ;;  %v698_v27 = vld [vmem:[%s1152_s4] ss:$0 sm:$0xff]  ;;  %s1107_s28 = scalar_lea.sflag [#allocation4], %s285_s9 }
  0x39   : > { %s292_s21 = scalar_lea.vmem %s1148_s0, %s690_s19  ;;  %v705_v42 = vld [vmem:[%s1154_s6] ss:$0 sm:$0xff]  ;;  %s287_s19 = scalar_lea.vmem [#allocation5], %s688_s14 }
  0x3a   : > { %v822_v2 = vld [vmem:[%s292_s21] sm:$0xff]   ;;  %v823_v3 = vld [vmem:[%s292_s21 + $0x8] sm:$0xff]   ;;  %737 = vmatpush3.bf16.msra.mxu0 %v821_v1  ;;  %s608_s20 = sshll.u32 %s287_s19, 4  ;;  %p1166_p9 = scmp.ne.s32.totalorder %s1159_s11, 0  ;;  %s1100_s20 = int_to_ptr.vmem [resolvable:$true] %s608_s20 }
  0x3b   : > { %738 = vmatprep.mubr.msk.bf16.mxu0 %vm333_vm0, %v822_v2  ;;  %745 = vmatpush3.bf16.msra.mxu1 %v825_v5  ;;  %s860_s22 = scalar_lea.vmem %s1100_s20, 512  ;;  %s931_s23 = smov [#allocation5]  }
  0x3c   : > { %746 = vmatprep.subr.bf16.mxu1 %v826_v6  ;;  %754 = vmatprep.subr.bf16.mxu0 %v828_v8  ;;  %p861_p6 = scmp.ne.s32.totalorder %s1100_s20, %s860_s22  ;;  %s864_s29 = sshll.u32 %s931_s23, 4  ;;  %s865_s29 = int_to_ptr.vmem [resolvable:$false] %s864_s29 }
  0x3d   : > { %739 = vmatmul.mubr.msk.bf16.vlgmr.msra.gmra.mrb[0].mxu0 %vm333_vm0, %v823_v3  ;;  %s866_s8 = scalar_lea.vmem %s865_s29, 1024  ;;  %p867_p2 = scmp.lt.s32.totalorder %s1100_s20, %s865_s29 }
  0x3e   : > { %755 = vmatpush3.bf16.msra.mxu0 %v828_v8  ;;  %p862_p10 = pnand %p861_p6, %p1166_p9  ;;  %p868_p3 = scmp.lt.s32.totalorder %s866_s8, %s860_s22 }
  0x3f   : > { %747 = vmatpush3.bf16.msra.mxu1 %v826_v6  ;;  %756 = vmatprep.subr.bf16.mxu0 %v829_v9 }
  0x40   : > { %748 = vmatprep.subr.bf16.mxu1 %v827_v7  ;;  %p863_p12 = pneg %p862_p10  ;;  %p869_p4 = por %p868_p3, %p867_p2 }
  0x42   : > { %757 = vmatpush3.bf16.msra.mxu0 %v829_v9  ;;  %p870_p7 = pnand %p869_p4, %p863_p12 }
  0x43   : > { %749 = vmatpush3.bf16.msra.mxu1 %v827_v7  ;;  %758 = vmatprep.subr.bf16.mxu0 %v830_v25 }
  0x46   : > { %759 = vmatpush3.bf16.msra.mxu0 %v830_v25 }
  0x47   : > { %760 = vmatprep.subr.bf16.mxu0 %v831_v26 }
  0x4a   : > { %761 = vmatpush3.bf16.msra.mxu0 %v831_v26 }
 0x110   : > { %v740_v11 = vpop.f32.mrb[0].mxu0 }
 0x111   : > { %v383_v12 = vadd.f32 %v740_v11, %v691_v10  ;;  %v374_v13 = vpop.f32.mrb[1].mxu0 }
 0x112   : > { %v375_v14 = vadd.f32 %v691_v10, %v374_v13  ;;  %v741_v15 = vpop.f32.mrb[2].mxu0 }
 0x113   : > { %v386_v16 = vadd.f32 %v741_v15, %v691_v10  ;;  %v377_v17 = vpop.f32.mrb[3].mxu0  ;;  %v391_v19 = vmax.f32 %v383_v12, 0.0 }
 0x114   : > { %v378_v18 = vadd.f32 %v691_v10, %v377_v17  ;;  %v389_v21 = vmax.f32 %v375_v14, 0.0 }
 0x115   : > { %v392_v20 = vmax.f32 %v386_v16, 0.0 }
 0x116   : > { %v390_v22 = vmax.f32 %v378_v18, 0.0 }
 0x117   : > { %v394_v23 = vpack.c.bf16 %v392_v20, %v391_v19 }
 0x118   : > { %v393_v24 = vpack.c.bf16 %v390_v22, %v389_v21 }
 0x11a   : > { %750 = vmatprep.mubr.msk.bf16.mxu1 %vm434_vm1, %v393_v24 }
 0x11b   : > { %751 = vmatmul.mubr.msk.bf16.vlgmr.msra.gmra.mrb[0].mxu1 %vm434_vm1, %v394_v23 }
 0x1ee   : > { %v752_v28 = vpop.f32.mrb[0].mxu1 }
 0x1ef   : > { %v484_v29 = vadd.f32 %v752_v28, %v698_v27  ;;  %v475_v30 = vpop.f32.mrb[1].mxu1 }
 0x1f0   : > { %v476_v31 = vadd.f32 %v698_v27, %v475_v30  ;;  %v753_v32 = vpop.f32.mrb[2].mxu1 }
 0x1f1   : > { %v487_v33 = vadd.f32 %v753_v32, %v698_v27  ;;  %v478_v34 = vpop.f32.mrb[3].mxu1  ;;  %v492_v36 = vmax.f32 %v484_v29, 0.0 }
 0x1f2   : > { %v479_v35 = vadd.f32 %v698_v27, %v478_v34  ;;  %v490_v38 = vmax.f32 %v476_v31, 0.0 }
 0x1f3   : > { %v493_v37 = vmax.f32 %v487_v33, 0.0 }
 0x1f4   : > { %v491_v39 = vmax.f32 %v479_v35, 0.0 }
 0x1f5   : > { %v495_v40 = vpack.c.bf16 %v493_v37, %v492_v36 }
 0x1f6   : > { %v494_v41 = vpack.c.bf16 %v491_v39, %v490_v38 }
 0x1f8   : > { %762 = vmatprep.mubr.msk.bf16.mxu0 %vm434_vm1, %v494_v41 }
 0x1f9   : > { %763 = vmatmul.mubr.msk.bf16.vlgmr.msra.gmra.mrb[4].mxu0 %vm434_vm1, %v495_v40 }
 0x2cc   : > { %v764_v43 = vpop.f32.mrb[4].mxu0 }
 0x2cd   : > { %v584_v44 = vadd.f32 %v764_v43, %v705_v42  ;;  %v575_v45 = vpop.f32.mrb[5].mxu0 }
 0x2ce   : > { %v576_v46 = vadd.f32 %v705_v42, %v575_v45  ;;  %v765_v47 = vpop.f32.mrb[6].mxu0 }
 0x2cf   : > { %592 = vst [vmem:[%s287_s19 + $0x10] sm:$0xff] %v584_v44  ;;  %v587_v48 = vadd.f32 %v765_v47, %v705_v42  ;;  %v578_v49 = vpop.f32.mrb[7].mxu0 }
 0x2d0   : > { %590 = vst [vmem:[%s287_s19] sm:$0xff] %v576_v46  ;;  %v579_v50 = vadd.f32 %v705_v42, %v578_v49 }
 0x2d1   : > { %593 = vst [vmem:[%s287_s19 + $0x18] sm:$0xff] %v587_v48 }
 0x2d2   : > { %591 = vst [vmem:[%s287_s19 + $0x8] sm:$0xff] %v579_v50 }
 0x2d3   : > { %873 = shalt.err (!%p870_p7)
}
 0x2d4   : > { %s874_s9 = scalar_lea.hbm %s1105_s15, 512  ;;  %s878_s18 = scalar_lea.hbm %s1155_s7, 1024 }
 0x2d5   : > { %p875_p8 = scmp.ne.s32.totalorder %s1105_s15, %s874_s9  ;;  %p879_p1 = scmp.lt.u32.totalorder %s1105_s15, %s1155_s7 }
 0x2d6   : > { %p880_p0 = scmp.lt.u32.totalorder %s878_s18, %s874_s9  ;;  %p882_p6 = scmp.lt.u32.totalorder %s874_s9, %s1105_s15 }
 0x2d7   : > { %p876_p11 = pnand %p875_p8, %p1166_p9 }
 0x2d8   : > { %p881_p5 = por %p880_p0, %p879_p1 }
 0x2d9   : > { %p877_p13 = pneg %p876_p11 }
 0x2da   : > { %p883_p10 = por %p882_p6, %p881_p5 }
 0x2dc   : > { %p884_p12 = pnand %p883_p10, %p877_p13 }
 0x2de   : > { %887 = shalt.err (!%p884_p12)
}
 0x2df   : > { %s932_s21 = smov 128   ;;  %s933_s13 = smov 8  }
 0x2e0   : > { %770 = dma.vmem_to_hbm [thread:$0]  (%p1166_p9), %s1100_s20, 512, %s1105_s15, %s1107_s28, %s932_s21, %s932_s21, %s933_s13  }
 0x2e1 PF: > { %p782_p2 = scmp.ge.s32.totalorder %s926_s27, 2  ;;  %s623_s22 = sand.u32 1, %s914_s24  }
 0x2e2   : > { %p1167_p3 = scmp.ne.s32.totalorder %s1160_s12, 0  ;;  %s624_s23 = scalar_lea.sflag [#allocation4], %s623_s22 }
 0x2e4   : > { %p777_p4 = pnand %p782_p2, %p1167_p3 }
 0x2e6   : > { %909 = dma.done.wait (!%p777_p4), %s624_s23, 512  }
 0x2e7   : > { %911 = vsyncadd (!%p777_p4), %s624_s23, 4294966784  ;;  %p18_p7 = scmp.ge.s32.totalorder %s999_s30, 4   ;;  %s1168_s24 = smov %s918_s25 }
 0x2e8   : > { %s1169_s25 = smov %s922_s26  ;;  %s1170_s26 = smov %s1010_s10 }
 0x2e9   : > { %s1171_s27 = smov %s999_s30  ;;  %20 = sbr.rel (!%p18_p7) target bundleno = 4 (0x4), region = 88 }
 0x2f0   :  { %629 = vsyncpa [#allocation3], 1 }
 0x2f1   :  { %631 = vsyncpa [#allocation3 + $0x1], 1 }
 0x2f2   :  { %632 = vsyncpa [#allocation4], 1 }
 0x2f3   :  { %634 = vsyncpa [#allocation4 + $0x1], 1 }

</bundles_post_ra>
